<compile_context>
chip_gen: v7x
topology: tpu7x:2x2x1
jax: 0.10.0
libtpu: 0.0.40
codegen_flags: <defaults>
</compile_context>

<pallas_src>
import jax
import jax.numpy as jnp
from jax.experimental import pallas as pl
from jax.experimental.pallas import tpu as pltpu

LAYER_COUNT = 8
LATENT_DIM = 512
BATCH = 8


def _round_up(x, m):
    return ((x + m - 1) // m) * m


def _fused_mapping_kernel(x_ref, w_ref, b_ref, o_ref):
    """One composite Linear over a batch tile: o = x @ W_tot^T + b_tot.

    x_ref: (TN, D)  input latent tile (x.dtype)
    w_ref: (D, D)   bf16 composed weight, already transposed to (in, out)
    b_ref: (TN, D)  f32 composed bias, pre-broadcast to the tile shape
    o_ref: (TN, D)  output tile
    """
    y = jnp.dot(x_ref[...].astype(jnp.bfloat16), w_ref[...],
                preferred_element_type=jnp.float32)   # f32 MXU accumulation
    o_ref[...] = (y + b_ref[...]).astype(o_ref.dtype)


def fold_mapping_params(weights, biases):
    """One-time init: compose the activation-free Linear stack into one Linear.

    weights: (L, D_out, D_in) nn.Linear weights, f32
    biases : (L, D) f32
    Returns (w_tot_t_bf16 of shape (D_in, D_out) in bf16, b_tot (D,) f32) such
    that  x @ w_tot_t + b_tot == fc_{L-1}(... fc_0(x) ...).
    Composition is done entirely in f32; only the final matrix is cast to bf16.
    """
    L, d_out, d_in = weights.shape
    assert d_out == d_in
    w_tot = jnp.eye(d_in, dtype=jnp.float32)       # running W1^T @ W2^T @ ...
    b_tot = jnp.zeros((d_in,), dtype=jnp.float32)
    for l in range(L):
        wt = weights[l].T.astype(jnp.float32)      # (D_in, D_out)
        w_tot = w_tot @ wt
        b_tot = b_tot @ wt + biases[l].astype(jnp.float32)
    return w_tot.astype(jnp.bfloat16), b_tot


def mapping_network_forward(x, w_tot_t_bf16, b_tot, *, batch_tile=None):
    """x: (N, C, H, W) with H == W == 1 (the module reshapes to (N, C)).

    w_tot_t_bf16: (D_in, D_out) bf16 composed weight (from fold_mapping_params)
    b_tot:        (D,) f32 composed bias
    Returns (N, C, H, W) in x.dtype.
    """
    n, c, h, w = x.shape
    assert h == 1 and w == 1, "reshape(n, c) requires h == w == 1"
    d_in, d_out = w_tot_t_bf16.shape
    assert d_in == c and d_out == c
    assert b_tot.shape == (c,)

    if batch_tile is None:
        # Big enough to amortize the ~0.35 us/grid-step overhead once the batch
        # grows, tiny in VMEM either way; clamp to the (sublane-padded) batch.
        batch_tile = min(256, _round_up(n, 8))
    n_pad = _round_up(n, batch_tile)

    x2 = x.reshape(n, c)
    if n_pad != n:
        x2 = jnp.pad(x2, ((0, n_pad - n), (0, 0)))
    # Pre-broadcast the bias to the tile shape (no in-kernel broadcast_in_dim,
    # no (1, 512) sublane padding).
    b_tile = jnp.broadcast_to(b_tot.astype(jnp.float32)[None, :], (batch_tile, c))

    grid = (n_pad // batch_tile,)
    out2 = pl.pallas_call(
        _fused_mapping_kernel,
        out_shape=jax.ShapeDtypeStruct((n_pad, c), x.dtype),
        grid_spec=pltpu.PrefetchScalarGridSpec(
            num_scalar_prefetch=0,
            grid=grid,
            in_specs=[
                pl.BlockSpec((batch_tile, c), lambda i: (i, 0)),  # x tile
                pl.BlockSpec((c, c), lambda i: (0, 0)),           # weights: one DMA, resident
                pl.BlockSpec((batch_tile, c), lambda i: (0, 0)),  # bias: resident
            ],
            out_specs=pl.BlockSpec((batch_tile, c), lambda i: (i, 0)),
        ),
        compiler_params=pltpu.CompilerParams(
            dimension_semantics=("parallel",)),  # megacore sharding when batch is large
    )(x2, w_tot_t_bf16, b_tile)

    if n_pad != n:
        out2 = out2[:n]
    return out2.reshape(n, c, h, w)


def _reference_forward(x, weights, biases):
    """Pure-JAX f32 layered reference matching the PyTorch module exactly."""
    n, c, h, w = x.shape
    y = x.reshape(n, c).astype(jnp.float32)
    for l in range(weights.shape[0]):
        y = y @ weights[l].T.astype(jnp.float32) + biases[l].astype(jnp.float32)
    return y.reshape(n, c, h, w).astype(x.dtype)


if __name__ == "__main__":
    key = jax.random.PRNGKey(0)
    kx, kw, kb = jax.random.split(key, 3)

    # nn.Linear-style init: U(-1/sqrt(in), 1/sqrt(in)); weights are (L, out, in).
    bound = 1.0 / (LATENT_DIM ** 0.5)
    weights = jax.random.uniform(
        kw, (LAYER_COUNT, LATENT_DIM, LATENT_DIM),
        minval=-bound, maxval=bound, dtype=jnp.float32)
    biases = jax.random.uniform(
        kb, (LAYER_COUNT, LATENT_DIM),
        minval=-bound, maxval=bound, dtype=jnp.float32)

    # One-time parameter prep ("at init", not per forward): fold the 8
    # activation-free layers into a single composite Linear (f32 compose,
    # bf16 weight cast).  8x fewer streamed weight bytes per forward.
    w_tot_t_bf16, b_tot = fold_mapping_params(weights, biases)

    x = jax.random.normal(kx, (BATCH, LATENT_DIM, 1, 1), dtype=jnp.float32)

    fwd = jax.jit(mapping_network_forward)
    out = jax.block_until_ready(fwd(x, w_tot_t_bf16, b_tot))

    ref = _reference_forward(x, weights, biases)
    assert out.shape == x.shape
    assert jnp.allclose(out, ref, rtol=2e-2, atol=2e-3), "mismatch vs reference"

    print("KERNEL_OK")
</pallas_src>

<mosaic_0001>
module attributes {stable_mosaic.version = 11 : i64} {
  func.func @_fused_mapping_kernel(%arg0: i32, %arg1: memref<8x512xf32, #tpu.memory_space<vmem>>, %arg2: memref<512x512xbf16, #tpu.memory_space<vmem>>, %arg3: memref<8x512xf32, #tpu.memory_space<vmem>>, %arg4: memref<8x512xf32, #tpu.memory_space<vmem>>) attributes {dimension_semantics = [#tpu.dimension_semantics<parallel>], iteration_bounds = array<i64: 1>, scalar_prefetch = 0 : i64, scratch_operands = 0 : i64, tpu.core_type = #tpu.core_type<tc>, window_params = [{transform_indices = @transform_0, window_bounds = array<i64: 8, 512>}, {pipeline_mode = #tpu.pipeline_mode<synchronous>, transform_indices = @transform_1, window_bounds = array<i64: 512, 512>}, {pipeline_mode = #tpu.pipeline_mode<synchronous>, transform_indices = @transform_2, window_bounds = array<i64: 8, 512>}, {transform_indices = @transform_3, window_bounds = array<i64: 8, 512>}]} {
    %c0 = arith.constant 0 : index
    %c0_0 = arith.constant 0 : index
    %0 = vector.load %arg1[%c0, %c0_0] : memref<8x512xf32, #tpu.memory_space<vmem>>, vector<8x512xf32>
    %1 = arith.truncf %0 : vector<8x512xf32> to vector<8x512xbf16>
    %c0_1 = arith.constant 0 : index
    %c0_2 = arith.constant 0 : index
    %2 = vector.load %arg2[%c0_1, %c0_2] : memref<512x512xbf16, #tpu.memory_space<vmem>>, vector<512x512xbf16>
    %cst = arith.constant dense<0.000000e+00> : vector<8x512xf32>
    %3 = tpu.matmul %1, %2, %cst {dimension_numbers = #tpu.dot_dimension_numbers<[1], [0], [0], [1], [0, 0, 1, 1], [], []>} : vector<8x512xbf16>, vector<512x512xbf16>, vector<8x512xf32> -> vector<8x512xf32>
    %c0_3 = arith.constant 0 : index
    %c0_4 = arith.constant 0 : index
    %4 = vector.load %arg3[%c0_3, %c0_4] : memref<8x512xf32, #tpu.memory_space<vmem>>, vector<8x512xf32>
    %5 = arith.addf %3, %4 : vector<8x512xf32>
    %c0_5 = arith.constant 0 : index
    %c0_6 = arith.constant 0 : index
    %6 = vector.load %arg4[%c0_5, %c0_6] : memref<8x512xf32, #tpu.memory_space<vmem>>, vector<8x512xf32>
    tpu.vector_store %arg4[%c0_5, %c0_6], %5 {strides = array<i32>} : memref<8x512xf32, #tpu.memory_space<vmem>>, vector<8x512xf32>,
    return
  }
  func.func @transform_0(%arg0: i32) -> (i32, i32) {
    %c0_i32 = arith.constant 0 : i32
    %c0_i32_0 = arith.constant 0 : i32
    return %arg0, %c0_i32 : i32, i32
  }
  func.func @transform_1(%arg0: i32) -> (i32, i32) {
    %c0_i32 = arith.constant 0 : i32
    %c0_i32_0 = arith.constant 0 : i32
    %c0_i32_1 = arith.constant 0 : i32
    return %c0_i32, %c0_i32_0 : i32, i32
  }
  func.func @transform_2(%arg0: i32) -> (i32, i32) {
    %c0_i32 = arith.constant 0 : i32
    %c0_i32_0 = arith.constant 0 : i32
    %c0_i32_1 = arith.constant 0 : i32
    return %c0_i32, %c0_i32_0 : i32, i32
  }
  func.func @transform_3(%arg0: i32) -> (i32, i32) {
    %c0_i32 = arith.constant 0 : i32
    %c0_i32_0 = arith.constant 0 : i32
    return %arg0, %c0_i32 : i32, i32
  }
}

</mosaic_0001>

<bundles_post_ra>
// kernel: mapping_network_forward.1
= control target key start
LH: loop header
LB: loop body
LE: loop exit
PB: predicated region body
PF: predicated region fallthrough
CT: control target
= control target key end

     0   :  { %8 = vsyncpa [#allocation3], 0  ;;  %s1340_s12 = smov [#allocation2]   ;;  %s1411_s0 = inlined_call_operand.vmem [shape: f32[8,512], index: 0, kind: input, shape index: {}]   ;;  %s1412_s1 = inlined_call_operand.hbm [shape: bf16[512,512], index: 1, kind: input, shape index: {}]   ;;  %s1413_s2 = inlined_call_operand.vmem [shape: f32[8,512], index: 2, kind: input, shape index: {}]   ;;  %s1414_s3 = inlined_call_operand.vmem [shape: f32[8,512], index: 3, kind: output, shape index: {}]  }
   0x1   :  { %s16_s13 = sshll.u32 %s1340_s12, 4  ;;  %s1316_s16 = scalar_lea.hbm %s1412_s1, 16384  ;;  %s17_s13 = int_to_ptr.vmem [resolvable:$true] %s16_s13 }
   0x2   :  { %p1317_p0 = scmp.ne.s32.totalorder %s1412_s1, %s1316_s16  ;;  %p1320_p1 = scmp.lt.u32.totalorder %s1316_s16, %s1412_s1 }
   0x4   :  { %p1322_p2 = pnand %p1320_p1, %p1317_p0 }
   0x6   :  { %1325 = shalt.err (!%p1322_p2)
}
   0x7   :  { %s1326_s21 = scalar_lea.vmem %s17_s13, 16384  ;;  %p1331_p4 = scmp.lt.s32.totalorder %s17_s13, %s17_s13 }
   0x8   :  { %p1327_p3 = scmp.ne.s32.totalorder %s17_s13, %s1326_s21  ;;  %p1332_p5 = scmp.lt.s32.totalorder %s1326_s21, %s1326_s21 }
   0xa   :  { %p1333_p6 = por %p1332_p5, %p1331_p4 }
   0xc   :  { %p1334_p7 = pnand %p1333_p6, %p1327_p3 }
   0xe   :  { %1337 = shalt.err (!%p1334_p7)
}
   0xf   :  { %s1341_s22 = smov 256   ;;  %s1342_s23 = smov 16  }
  0x10   :  { %22 = dma.hbm_to_vmem [thread:$0]  %s1412_s1, 16384, %s17_s13, [#allocation3], %s1341_s22, %s1341_s22, %s1342_s23  }
  0x11   :  { %1338 = dma.done.wait [#allocation3], 16384  }
  0x12   :  { %1339 = vsyncadd [#allocation3], 4294950912  ;;  %v1124_v0 = vld [vmem:[#allocation2 + $0x4] ss:$16 sps:$4 sm:$0xff]   ;;  %v1126_v1 = vld [vmem:[#allocation2 + $0xc] ss:$16 sps:$4 sm:$0xff]  }
  0x13   :  { %808 = vmatprep.subr.bf16.mxu0 %v1124_v0  ;;  %v1128_v2 = vld [vmem:[#allocation2] ss:$16 sps:$4 sm:$0xff]   ;;  %v1129_v3 = vld [vmem:[#allocation2 + $0x8] ss:$16 sps:$4 sm:$0xff]   ;;  %890 = vmatprep.subr.bf16.mxu1 %v1126_v1  ;;  %v1130_v4 = vld [vmem:[#allocation2 + $0x24] ss:$16 sps:$4 sm:$0xff]  }
  0x14   :  { %809 = vmatpush1.bf16.msra.mxu0 %v1128_v2  ;;  %891 = vmatpush1.bf16.msra.mxu1 %v1129_v3  ;;  %v1132_v5 = vld [vmem:[#allocation2 + $0x2c] ss:$16 sps:$4 sm:$0xff]   ;;  %v1134_v6 = vld [vmem:[#allocation2 + $0x20] ss:$16 sps:$4 sm:$0xff]   ;;  %v1135_v7 = vld [vmem:[#allocation2 + $0x28] ss:$16 sps:$4 sm:$0xff]  }
  0x15   :  { %810 = vmatprep.subr.bf16.mxu0 %v1130_v4  ;;  %892 = vmatprep.subr.bf16.mxu1 %v1132_v5  ;;  %v1136_v8 = vld [vmem:[#allocation2 + $0x44] ss:$16 sps:$4 sm:$0xff]   ;;  %v1138_v9 = vld [vmem:[#allocation2 + $0x4c] ss:$16 sps:$4 sm:$0xff]   ;;  %v1140_v10 = vld [vmem:[#allocation2 + $0x40] ss:$16 sps:$4 sm:$0xff]  }
  0x16   :  { %v1141_v11 = vld [vmem:[#allocation2 + $0x48] ss:$16 sps:$4 sm:$0xff]   ;;  %v1142_v12 = vld [vmem:[#allocation2 + $0x64] ss:$16 sps:$4 sm:$0xff]   ;;  %v1144_v13 = vld [vmem:[#allocation2 + $0x6c] ss:$16 sps:$4 sm:$0xff]  }
  0x17   :  { %v1146_v14 = vld [vmem:[#allocation2 + $0x60] ss:$16 sps:$4 sm:$0xff]   ;;  %v1147_v15 = vld [vmem:[#allocation2 + $0x68] ss:$16 sps:$4 sm:$0xff]   ;;  %v1148_v16 = vld [vmem:[#allocation2 + $0x84] ss:$16 sps:$4 sm:$0xff]  }
  0x18   :  { %811 = vmatpush1.bf16.msra.mxu0 %v1134_v6  ;;  %893 = vmatpush1.bf16.msra.mxu1 %v1135_v7  ;;  %v1150_v17 = vld [vmem:[#allocation2 + $0x8c] ss:$16 sps:$4 sm:$0xff]   ;;  %v1152_v18 = vld [vmem:[#allocation2 + $0x80] ss:$16 sps:$4 sm:$0xff]   ;;  %v1153_v19 = vld [vmem:[#allocation2 + $0x88] ss:$16 sps:$4 sm:$0xff]  }
  0x19   :  { %812 = vmatprep.subr.bf16.mxu0 %v1136_v8  ;;  %894 = vmatprep.subr.bf16.mxu1 %v1138_v9  ;;  %v1154_v20 = vld [vmem:[#allocation2 + $0xa4] ss:$16 sps:$4 sm:$0xff]   ;;  %v1156_v21 = vld [vmem:[#allocation2 + $0xac] ss:$16 sps:$4 sm:$0xff]   ;;  %v1158_v22 = vld [vmem:[#allocation2 + $0xa0] ss:$16 sps:$4 sm:$0xff]  }
  0x1a   :  { %v1159_v23 = vld [vmem:[#allocation2 + $0xa8] ss:$16 sps:$4 sm:$0xff]   ;;  %v1160_v24 = vld [vmem:[#allocation2 + $0xc4] ss:$16 sps:$4 sm:$0xff]   ;;  %v1162_v25 = vld [vmem:[#allocation2 + $0xcc] ss:$16 sps:$4 sm:$0xff]  }
  0x1b   :  { %v1164_v26 = vld [vmem:[#allocation2 + $0xc0] ss:$16 sps:$4 sm:$0xff]   ;;  %v1165_v27 = vld [vmem:[#allocation2 + $0xc8] ss:$16 sps:$4 sm:$0xff]   ;;  %v1166_v28 = vld [vmem:[#allocation2 + $0xe4] ss:$16 sps:$4 sm:$0xff]  }
  0x1c   :  { %813 = vmatpush1.bf16.msra.mxu0 %v1140_v10  ;;  %895 = vmatpush1.bf16.msra.mxu1 %v1141_v11  ;;  %v1168_v29 = vld [vmem:[#allocation2 + $0xec] ss:$16 sps:$4 sm:$0xff]   ;;  %v1170_v30 = vld [vmem:[#allocation2 + $0xe0] ss:$16 sps:$4 sm:$0xff]   ;;  %v1171_v31 = vld [vmem:[#allocation2 + $0xe8] ss:$16 sps:$4 sm:$0xff]  }
  0x1d   :  { %814 = vmatprep.subr.bf16.mxu0 %v1142_v12  ;;  %896 = vmatprep.subr.bf16.mxu1 %v1144_v13  ;;  %v1172_v32 = vld [vmem:[#allocation2 + $0x104] ss:$16 sps:$4 sm:$0xff]   ;;  %v1174_v33 = vld [vmem:[#allocation2 + $0x10c] ss:$16 sps:$4 sm:$0xff]   ;;  %v1176_v34 = vld [vmem:[#allocation2 + $0x100] ss:$16 sps:$4 sm:$0xff]  }
  0x1e   :  { %v1177_v35 = vld [vmem:[#allocation2 + $0x108] ss:$16 sps:$4 sm:$0xff]   ;;  %v1178_v36 = vld [vmem:[#allocation2 + $0x124] ss:$16 sps:$4 sm:$0xff]   ;;  %v1180_v37 = vld [vmem:[#allocation2 + $0x12c] ss:$16 sps:$4 sm:$0xff]  }
  0x1f   :  { %v1182_v38 = vld [vmem:[#allocation2 + $0x120] ss:$16 sps:$4 sm:$0xff]   ;;  %v1183_v39 = vld [vmem:[#allocation2 + $0x128] ss:$16 sps:$4 sm:$0xff]   ;;  %v1184_v40 = vld [vmem:[#allocation2 + $0x144] ss:$16 sps:$4 sm:$0xff]  }
  0x20   :  { %815 = vmatpush1.bf16.msra.mxu0 %v1146_v14  ;;  %897 = vmatpush1.bf16.msra.mxu1 %v1147_v15  ;;  %v1186_v41 = vld [vmem:[#allocation2 + $0x14c] ss:$16 sps:$4 sm:$0xff]   ;;  %v1188_v42 = vld [vmem:[#allocation2 + $0x140] ss:$16 sps:$4 sm:$0xff]   ;;  %v1189_v43 = vld [vmem:[#allocation2 + $0x148] ss:$16 sps:$4 sm:$0xff]  }
  0x21   :  { %816 = vmatprep.subr.bf16.mxu0 %v1148_v16  ;;  %898 = vmatprep.subr.bf16.mxu1 %v1150_v17  ;;  %v1190_v44 = vld [vmem:[#allocation2 + $0x164] ss:$16 sps:$4 sm:$0xff]   ;;  %v1192_v45 = vld [vmem:[#allocation2 + $0x16c] ss:$16 sps:$4 sm:$0xff]   ;;  %v1194_v47 = vld [vmem:[#allocation2 + $0x160] ss:$16 sps:$4 sm:$0xff]  }
  0x22   :  { %v29_v46 = vld [vmem:[%s1411_s0 + $0x8] sm:$0xff]  ;;  %v1196_v50 = vld [vmem:[#allocation2 + $0x184] ss:$16 sps:$4 sm:$0xff]   ;;  %v1200_v52 = vld [vmem:[#allocation2 + $0x180] ss:$16 sps:$4 sm:$0xff]  }
  0x23   :  { %v33_v48 = vpack.c.bf16 %v29_v46, %v29_v46  ;;  %v1195_v49 = vld [vmem:[#allocation2 + $0x168] ss:$16 sps:$4 sm:$0xff]   ;;  %v1198_v51 = vld [vmem:[#allocation2 + $0x18c] ss:$16 sps:$4 sm:$0xff]   ;;  %v1202_v54 = vld [vmem:[#allocation2 + $0x1a4] ss:$16 sps:$4 sm:$0xff]  }
  0x24   :  { %817 = vmatpush1.bf16.msra.mxu0 %v1152_v18  ;;  %899 = vmatpush1.bf16.msra.mxu1 %v1153_v19  ;;  %v1201_v53 = vld [vmem:[#allocation2 + $0x188] ss:$16 sps:$4 sm:$0xff]   ;;  %v1204_v55 = vld [vmem:[#allocation2 + $0x1ac] ss:$16 sps:$4 sm:$0xff]   ;;  %v1206_v56 = vld [vmem:[#allocation2 + $0x1a0] ss:$16 sps:$4 sm:$0xff]  }
  0x25   :  { %818 = vmatprep.subr.bf16.mxu0 %v1154_v20  ;;  %900 = vmatprep.subr.bf16.mxu1 %v1156_v21  ;;  %v1207_v57 = vld [vmem:[#allocation2 + $0x1a8] ss:$16 sps:$4 sm:$0xff]   ;;  %v1208_v58 = vld [vmem:[#allocation2 + $0x1c4] ss:$16 sps:$4 sm:$0xff]   ;;  %v1210_v59 = vld [vmem:[#allocation2 + $0x1cc] ss:$16 sps:$4 sm:$0xff]  }
  0x26   :  { %840 = vmatprep.mubr.bf16.mxu0 %v33_v48  ;;  %922 = vmatprep.mubr.bf16.mxu1 %v33_v48  ;;  %v1212_v60 = vld [vmem:[#allocation2 + $0x1c0] ss:$16 sps:$4 sm:$0xff]   ;;  %v1213_v61 = vld [vmem:[#allocation2 + $0x1c8] ss:$16 sps:$4 sm:$0xff]   ;;  %v1214_v62 = vld [vmem:[#allocation2 + $0x1e4] ss:$16 sps:$4 sm:$0xff]  }
  0x27   :  { %v1216_v63 = vld [vmem:[#allocation2 + $0x1ec] ss:$16 sps:$4 sm:$0xff]   ;;  %v1218_v0 = vld [vmem:[#allocation2 + $0x1e0] ss:$16 sps:$4 sm:$0xff]   ;;  %v1219_v1 = vld [vmem:[#allocation2 + $0x1e8] ss:$16 sps:$4 sm:$0xff]  }
  0x28   :  { %819 = vmatpush1.bf16.msra.mxu0 %v1158_v22  ;;  %901 = vmatpush1.bf16.msra.mxu1 %v1159_v23  ;;  %v28_v2 = vld [vmem:[%s1411_s0] sm:$0xff]  ;;  %v1225_v4 = vld [vmem:[#allocation2 + $0x20c] ss:$16 sps:$4 sm:$0xff]   ;;  %v1223_v7 = vld [vmem:[#allocation2 + $0x208] ss:$16 sps:$4 sm:$0xff]  }
  0x29   :  { %820 = vmatprep.subr.bf16.mxu0 %v1160_v24  ;;  %902 = vmatprep.subr.bf16.mxu1 %v1162_v25  ;;  %v1222_v3 = vld [vmem:[#allocation2 + $0x204] ss:$16 sps:$4 sm:$0xff]   ;;  %v32_v5 = vpack.c.bf16 %v28_v2, %v28_v2  ;;  %v1220_v6 = vld [vmem:[#allocation2 + $0x200] ss:$16 sps:$4 sm:$0xff]   ;;  %v1231_v9 = vld [vmem:[#allocation2 + $0x22c] ss:$16 sps:$4 sm:$0xff]  }
  0x2a   :  { %v1228_v8 = vld [vmem:[#allocation2 + $0x224] ss:$16 sps:$4 sm:$0xff]   ;;  %v1226_v10 = vld [vmem:[#allocation2 + $0x220] ss:$16 sps:$4 sm:$0xff]   ;;  %v1229_v11 = vld [vmem:[#allocation2 + $0x228] ss:$16 sps:$4 sm:$0xff]  }
  0x2b   :  { %v1234_v12 = vld [vmem:[#allocation2 + $0x244] ss:$16 sps:$4 sm:$0xff]   ;;  %v1237_v13 = vld [vmem:[#allocation2 + $0x24c] ss:$16 sps:$4 sm:$0xff]   ;;  %v1232_v14 = vld [vmem:[#allocation2 + $0x240] ss:$16 sps:$4 sm:$0xff]  }
  0x2c   :  { %821 = vmatpush1.bf16.msra.mxu0 %v1164_v26  ;;  %903 = vmatpush1.bf16.msra.mxu1 %v1165_v27  ;;  %v1235_v15 = vld [vmem:[#allocation2 + $0x248] ss:$16 sps:$4 sm:$0xff]   ;;  %v1240_v16 = vld [vmem:[#allocation2 + $0x264] ss:$16 sps:$4 sm:$0xff]   ;;  %v1243_v17 = vld [vmem:[#allocation2 + $0x26c] ss:$16 sps:$4 sm:$0xff]  }
  0x2d   :  { %822 = vmatprep.subr.bf16.mxu0 %v1166_v28  ;;  %904 = vmatprep.subr.bf16.mxu1 %v1168_v29  ;;  %v1238_v18 = vld [vmem:[#allocation2 + $0x260] ss:$16 sps:$4 sm:$0xff]   ;;  %v1241_v19 = vld [vmem:[#allocation2 + $0x268] ss:$16 sps:$4 sm:$0xff]   ;;  %v1246_v20 = vld [vmem:[#allocation2 + $0x284] ss:$16 sps:$4 sm:$0xff]  }
  0x2e   :  { %v1249_v21 = vld [vmem:[#allocation2 + $0x28c] ss:$16 sps:$4 sm:$0xff]   ;;  %v1244_v22 = vld [vmem:[#allocation2 + $0x280] ss:$16 sps:$4 sm:$0xff]   ;;  %v1247_v23 = vld [vmem:[#allocation2 + $0x288] ss:$16 sps:$4 sm:$0xff]  }
  0x2f   :  { %v1252_v24 = vld [vmem:[#allocation2 + $0x2a4] ss:$16 sps:$4 sm:$0xff]   ;;  %v1255_v25 = vld [vmem:[#allocation2 + $0x2ac] ss:$16 sps:$4 sm:$0xff]   ;;  %v1250_v26 = vld [vmem:[#allocation2 + $0x2a0] ss:$16 sps:$4 sm:$0xff]  }
  0x30   :  { %823 = vmatpush1.bf16.msra.mxu0 %v1170_v30  ;;  %905 = vmatpush1.bf16.msra.mxu1 %v1171_v31  ;;  %v1253_v27 = vld [vmem:[#allocation2 + $0x2a8] ss:$16 sps:$4 sm:$0xff]   ;;  %v1258_v28 = vld [vmem:[#allocation2 + $0x2c4] ss:$16 sps:$4 sm:$0xff]   ;;  %v1261_v29 = vld [vmem:[#allocation2 + $0x2cc] ss:$16 sps:$4 sm:$0xff]  }
  0x31   :  { %824 = vmatprep.subr.bf16.mxu0 %v1172_v32  ;;  %906 = vmatprep.subr.bf16.mxu1 %v1174_v33  ;;  %v31_v30 = vld [vmem:[%s1411_s0 + $0x18] sm:$0xff]  ;;  %v1256_v32 = vld [vmem:[#allocation2 + $0x2c0] ss:$16 sps:$4 sm:$0xff]   ;;  %v1282_v46 = vld [vmem:[#allocation2 + $0x344] ss:$16 sps:$4 sm:$0xff]  }
  0x32   :  { %v35_v31 = vpack.c.bf16 %v31_v30, %v31_v30  ;;  %v1259_v33 = vld [vmem:[#allocation2 + $0x2c8] ss:$16 sps:$4 sm:$0xff]   ;;  %v1280_v48 = vld [vmem:[#allocation2 + $0x340] ss:$16 sps:$4 sm:$0xff]   ;;  %v1312_v2 = vld [vmem:[#allocation2 + $0x3e4] ss:$16 sps:$4 sm:$0xff]  }
  0x34   :  { %825 = vmatpush1.bf16.msra.mxu0 %v1176_v34  ;;  %907 = vmatpush1.bf16.msra.mxu1 %v1177_v35  ;;  %v1264_v34 = vld [vmem:[#allocation2 + $0x2e4] ss:$16 sps:$4 sm:$0xff]   ;;  %v1267_v35 = vld [vmem:[#allocation2 + $0x2ec] ss:$16 sps:$4 sm:$0xff]  }
  0x35   :  { %826 = vmatprep.subr.bf16.mxu0 %v1178_v36  ;;  %908 = vmatprep.subr.bf16.mxu1 %v1180_v37  ;;  %v1262_v36 = vld [vmem:[#allocation2 + $0x2e0] ss:$16 sps:$4 sm:$0xff]   ;;  %v1265_v37 = vld [vmem:[#allocation2 + $0x2e8] ss:$16 sps:$4 sm:$0xff]  }
  0x38   :  { %827 = vmatpush1.bf16.msra.mxu0 %v1182_v38  ;;  %909 = vmatpush1.bf16.msra.mxu1 %v1183_v39  ;;  %v1270_v38 = vld [vmem:[#allocation2 + $0x304] ss:$16 sps:$4 sm:$0xff]   ;;  %v1273_v39 = vld [vmem:[#allocation2 + $0x30c] ss:$16 sps:$4 sm:$0xff]  }
  0x39   :  { %828 = vmatprep.subr.bf16.mxu0 %v1184_v40  ;;  %910 = vmatprep.subr.bf16.mxu1 %v1186_v41  ;;  %v1268_v40 = vld [vmem:[#allocation2 + $0x300] ss:$16 sps:$4 sm:$0xff]   ;;  %v1271_v41 = vld [vmem:[#allocation2 + $0x308] ss:$16 sps:$4 sm:$0xff]  }
  0x3c   :  { %829 = vmatpush1.bf16.msra.mxu0 %v1188_v42  ;;  %911 = vmatpush1.bf16.msra.mxu1 %v1189_v43  ;;  %v1276_v42 = vld [vmem:[#allocation2 + $0x324] ss:$16 sps:$4 sm:$0xff]   ;;  %v1279_v43 = vld [vmem:[#allocation2 + $0x32c] ss:$16 sps:$4 sm:$0xff]  }
  0x3d   :  { %830 = vmatprep.subr.bf16.mxu0 %v1190_v44  ;;  %912 = vmatprep.subr.bf16.mxu1 %v1192_v45  ;;  %v1274_v44 = vld [vmem:[#allocation2 + $0x320] ss:$16 sps:$4 sm:$0xff]   ;;  %v1277_v45 = vld [vmem:[#allocation2 + $0x328] ss:$16 sps:$4 sm:$0xff]  }
  0x40   :  { %831 = vmatpush1.bf16.msra.mxu0 %v1194_v47  ;;  %913 = vmatpush1.bf16.msra.mxu1 %v1195_v49  ;;  %v1285_v47 = vld [vmem:[#allocation2 + $0x34c] ss:$16 sps:$4 sm:$0xff]   ;;  %v1283_v49 = vld [vmem:[#allocation2 + $0x348] ss:$16 sps:$4 sm:$0xff]  }
  0x41   :  { %832 = vmatprep.subr.bf16.mxu0 %v1196_v50  ;;  %914 = vmatprep.subr.bf16.mxu1 %v1198_v51  ;;  %v1288_v50 = vld [vmem:[#allocation2 + $0x364] ss:$16 sps:$4 sm:$0xff]   ;;  %v1291_v51 = vld [vmem:[#allocation2 + $0x36c] ss:$16 sps:$4 sm:$0xff]  }
  0x44   :  { %833 = vmatpush1.bf16.msra.mxu0 %v1200_v52  ;;  %915 = vmatpush1.bf16.msra.mxu1 %v1201_v53  ;;  %v1286_v52 = vld [vmem:[#allocation2 + $0x360] ss:$16 sps:$4 sm:$0xff]   ;;  %v1289_v53 = vld [vmem:[#allocation2 + $0x368] ss:$16 sps:$4 sm:$0xff]  }
  0x45   :  { %834 = vmatprep.subr.bf16.mxu0 %v1202_v54  ;;  %916 = vmatprep.subr.bf16.mxu1 %v1204_v55  ;;  %v1294_v54 = vld [vmem:[#allocation2 + $0x384] ss:$16 sps:$4 sm:$0xff]   ;;  %v1297_v55 = vld [vmem:[#allocation2 + $0x38c] ss:$16 sps:$4 sm:$0xff]  }
  0x48   :  { %835 = vmatpush1.bf16.msra.mxu0 %v1206_v56  ;;  %917 = vmatpush1.bf16.msra.mxu1 %v1207_v57  ;;  %v1292_v56 = vld [vmem:[#allocation2 + $0x380] ss:$16 sps:$4 sm:$0xff]   ;;  %v1295_v57 = vld [vmem:[#allocation2 + $0x388] ss:$16 sps:$4 sm:$0xff]  }
  0x49   :  { %836 = vmatprep.subr.bf16.mxu0 %v1208_v58  ;;  %918 = vmatprep.subr.bf16.mxu1 %v1210_v59  ;;  %v1300_v58 = vld [vmem:[#allocation2 + $0x3a4] ss:$16 sps:$4 sm:$0xff]   ;;  %v1303_v59 = vld [vmem:[#allocation2 + $0x3ac] ss:$16 sps:$4 sm:$0xff]  }
  0x4c   :  { %837 = vmatpush1.bf16.msra.mxu0 %v1212_v60  ;;  %919 = vmatpush1.bf16.msra.mxu1 %v1213_v61  ;;  %v1298_v60 = vld [vmem:[#allocation2 + $0x3a0] ss:$16 sps:$4 sm:$0xff]   ;;  %v1301_v61 = vld [vmem:[#allocation2 + $0x3a8] ss:$16 sps:$4 sm:$0xff]  }
  0x4d   :  { %838 = vmatprep.subr.bf16.mxu0 %v1214_v62  ;;  %920 = vmatprep.subr.bf16.mxu1 %v1216_v63  ;;  %v1306_v62 = vld [vmem:[#allocation2 + $0x3c4] ss:$16 sps:$4 sm:$0xff]   ;;  %v1309_v63 = vld [vmem:[#allocation2 + $0x3cc] ss:$16 sps:$4 sm:$0xff]  }
  0x50   :  { %839 = vmatpush1.bf16.msra.mxu0 %v1218_v0  ;;  %921 = vmatpush1.bf16.msra.mxu1 %v1219_v1  ;;  %v1304_v0 = vld [vmem:[#allocation2 + $0x3c0] ss:$16 sps:$4 sm:$0xff]   ;;  %v1307_v1 = vld [vmem:[#allocation2 + $0x3c8] ss:$16 sps:$4 sm:$0xff]  }
  0x51   :  { %849 = vmatprep.subr.bf16.mxu0 %v1222_v3  ;;  %931 = vmatprep.subr.bf16.mxu1 %v1225_v4  ;;  %v1315_v3 = vld [vmem:[#allocation2 + $0x3ec] ss:$16 sps:$4 sm:$0xff]   ;;  %v1310_v4 = vld [vmem:[#allocation2 + $0x3e0] ss:$16 sps:$4 sm:$0xff]  }
  0x53   :  { %841 = vmatmul.mubr.bf16.vlgmr.msra.gmra.mrb[0].mxu0 %v32_v5  ;;  %923 = vmatmul.mubr.bf16.vlgmr.msra.gmra.mrb[0].mxu1 %v32_v5  ;;  %v1313_v5 = vld [vmem:[#allocation2 + $0x3e8] ss:$16 sps:$4 sm:$0xff]  }
  0x54   :  { %850 = vmatpush1.bf16.msra.mxu0 %v1220_v6  ;;  %932 = vmatpush1.bf16.msra.mxu1 %v1223_v7  ;;  %v30_v6 = vld [vmem:[%s1411_s0 + $0x10] sm:$0xff] }
  0x55   :  { %851 = vmatprep.subr.bf16.mxu0 %v1228_v8  ;;  %933 = vmatprep.subr.bf16.mxu1 %v1231_v9  ;;  %v34_v7 = vpack.c.bf16 %v30_v6, %v30_v6  ;;  %v164_v8 = vld [vmem:[%s1413_s2] sm:$0xff]  ;;  %v166_v9 = vld [vmem:[%s1413_s2 + $0x10] sm:$0xff] }
  0x56   :  { %881 = vmatprep.mubr.bf16.mxu0 %v35_v31  ;;  %963 = vmatprep.mubr.bf16.mxu1 %v35_v31 }
  0x58   :  { %852 = vmatpush1.bf16.msra.mxu0 %v1226_v10  ;;  %934 = vmatpush1.bf16.msra.mxu1 %v1229_v11  ;;  %v165_v10 = vld [vmem:[%s1413_s2 + $0x8] sm:$0xff]  ;;  %v167_v11 = vld [vmem:[%s1413_s2 + $0x18] sm:$0xff] }
  0x59   :  { %853 = vmatprep.subr.bf16.mxu0 %v1234_v12  ;;  %935 = vmatprep.subr.bf16.mxu1 %v1237_v13 }
  0x5c   :  { %854 = vmatpush1.bf16.msra.mxu0 %v1232_v14  ;;  %936 = vmatpush1.bf16.msra.mxu1 %v1235_v15 }
  0x5d   :  { %855 = vmatprep.subr.bf16.mxu0 %v1240_v16  ;;  %937 = vmatprep.subr.bf16.mxu1 %v1243_v17 }
  0x60   :  { %856 = vmatpush1.bf16.msra.mxu0 %v1238_v18  ;;  %938 = vmatpush1.bf16.msra.mxu1 %v1241_v19 }
  0x61   :  { %857 = vmatprep.subr.bf16.mxu0 %v1246_v20  ;;  %939 = vmatprep.subr.bf16.mxu1 %v1249_v21 }
  0x64   :  { %858 = vmatpush1.bf16.msra.mxu0 %v1244_v22  ;;  %940 = vmatpush1.bf16.msra.mxu1 %v1247_v23 }
  0x65   :  { %859 = vmatprep.subr.bf16.mxu0 %v1252_v24  ;;  %941 = vmatprep.subr.bf16.mxu1 %v1255_v25 }
  0x68   :  { %860 = vmatpush1.bf16.msra.mxu0 %v1250_v26  ;;  %942 = vmatpush1.bf16.msra.mxu1 %v1253_v27 }
  0x69   :  { %861 = vmatprep.subr.bf16.mxu0 %v1258_v28  ;;  %943 = vmatprep.subr.bf16.mxu1 %v1261_v29 }
  0x6c   :  { %862 = vmatpush1.bf16.msra.mxu0 %v1256_v32  ;;  %944 = vmatpush1.bf16.msra.mxu1 %v1259_v33 }
  0x6d   :  { %863 = vmatprep.subr.bf16.mxu0 %v1264_v34  ;;  %945 = vmatprep.subr.bf16.mxu1 %v1267_v35 }
  0x70   :  { %864 = vmatpush1.bf16.msra.mxu0 %v1262_v36  ;;  %946 = vmatpush1.bf16.msra.mxu1 %v1265_v37 }
  0x71   :  { %865 = vmatprep.subr.bf16.mxu0 %v1270_v38  ;;  %947 = vmatprep.subr.bf16.mxu1 %v1273_v39 }
  0x74   :  { %866 = vmatpush1.bf16.msra.mxu0 %v1268_v40  ;;  %948 = vmatpush1.bf16.msra.mxu1 %v1271_v41 }
  0x75   :  { %867 = vmatprep.subr.bf16.mxu0 %v1276_v42  ;;  %949 = vmatprep.subr.bf16.mxu1 %v1279_v43 }
  0x78   :  { %868 = vmatpush1.bf16.msra.mxu0 %v1274_v44  ;;  %950 = vmatpush1.bf16.msra.mxu1 %v1277_v45 }
  0x79   :  { %869 = vmatprep.subr.bf16.mxu0 %v1282_v46  ;;  %951 = vmatprep.subr.bf16.mxu1 %v1285_v47 }
  0x7c   :  { %870 = vmatpush1.bf16.msra.mxu0 %v1280_v48  ;;  %952 = vmatpush1.bf16.msra.mxu1 %v1283_v49 }
  0x7d   :  { %871 = vmatprep.subr.bf16.mxu0 %v1288_v50  ;;  %953 = vmatprep.subr.bf16.mxu1 %v1291_v51 }
  0x80   :  { %872 = vmatpush1.bf16.msra.mxu0 %v1286_v52  ;;  %954 = vmatpush1.bf16.msra.mxu1 %v1289_v53 }
  0x81   :  { %873 = vmatprep.subr.bf16.mxu0 %v1294_v54  ;;  %955 = vmatprep.subr.bf16.mxu1 %v1297_v55 }
  0x84   :  { %874 = vmatpush1.bf16.msra.mxu0 %v1292_v56  ;;  %956 = vmatpush1.bf16.msra.mxu1 %v1295_v57 }
  0x85   :  { %875 = vmatprep.subr.bf16.mxu0 %v1300_v58  ;;  %957 = vmatprep.subr.bf16.mxu1 %v1303_v59 }
  0x88   :  { %876 = vmatpush1.bf16.msra.mxu0 %v1298_v60  ;;  %958 = vmatpush1.bf16.msra.mxu1 %v1301_v61 }
  0x89   :  { %877 = vmatprep.subr.bf16.mxu0 %v1306_v62  ;;  %959 = vmatprep.subr.bf16.mxu1 %v1309_v63 }
  0x8c   :  { %878 = vmatpush1.bf16.msra.mxu0 %v1304_v0  ;;  %960 = vmatpush1.bf16.msra.mxu1 %v1307_v1 }
  0x8d   :  { %879 = vmatprep.subr.bf16.mxu0 %v1312_v2  ;;  %961 = vmatprep.subr.bf16.mxu1 %v1315_v3 }
  0x90   :  { %880 = vmatpush1.bf16.msra.mxu0 %v1310_v4  ;;  %962 = vmatpush1.bf16.msra.mxu1 %v1313_v5 }
  0x93   :  { %882 = vmatmul.mubr.bf16.vlgmr.msra.gmra.mrb[0].mxu0 %v34_v7  ;;  %964 = vmatmul.mubr.bf16.vlgmr.msra.gmra.mrb[0].mxu1 %v34_v7 }
 0x166   :  { %v883_v12 = vpop.f32.mrb[0].mxu0  ;;  %v965_v13 = vpop.f32.mrb[0].mxu1 }
 0x167   :  { %v1109_v14 = vadd.f32 %v883_v12, %v164_v8  ;;  %v1111_v15 = vadd.f32 %v965_v13, %v166_v9  ;;  %v885_v16 = vpop.f32.mrb[1].mxu0  ;;  %v967_v17 = vpop.f32.mrb[1].mxu1 }
 0x168   :  { %v1110_v18 = vadd.f32 %v885_v16, %v165_v10  ;;  %v1112_v19 = vadd.f32 %v967_v17, %v167_v11  ;;  %v887_v20 = vpop.f32.mrb[2].mxu0  ;;  %v969_v21 = vpop.f32.mrb[2].mxu1 }
 0x169   :  { %972 = vst [vmem:[%s1414_s3] sm:$0xff] %v1109_v14  ;;  %974 = vst [vmem:[%s1414_s3 + $0x10] sm:$0xff] %v1111_v15  ;;  %v888_v22 = vpop.f32.mrb[3].mxu0  ;;  %v970_v23 = vpop.f32.mrb[3].mxu1 }
 0x16a   :  { %973 = vst [vmem:[%s1414_s3 + $0x8] sm:$0xff] %v1110_v18  ;;  %975 = vst [vmem:[%s1414_s3 + $0x18] sm:$0xff] %v1112_v19 }
 0x16b   :  { %980 = vsyncpa [#allocation3], 1 }

</bundles_post_ra>
